<compile_context>
chip_gen: v7x
topology: tpu7x:2x2x1
jax: 0.10.0
libtpu: 0.0.40
codegen_flags: <defaults>
</compile_context>

<pallas_src>
import jax
import jax.numpy as jnp
from jax import lax
from jax.experimental import pallas as pl
from jax.experimental.pallas import tpu as pltpu


# --------------------------------------------------------------------------- #
# Kernel bodies
# --------------------------------------------------------------------------- #
def _ffn_tile(x_ref, wi_ref, wo_ref):
    """relu(x @ wi_tile) @ wo_tile for one (token-tile, d_ff-tile); f32 result."""
    x = x_ref[...]
    if x.dtype != wi_ref.dtype:
        # Allows bf16 weight stacks with f32 activations (cast once per tile).
        x = x.astype(wi_ref.dtype)
    # (tm, d_model) @ (d_model, tk): native (M,K)x(K,N) MXU orientation.
    h = jnp.dot(x, wi_ref[...], preferred_element_type=jnp.float32)
    h = jnp.maximum(h, 0.0)  # ACT2FN["relu"]
    # TODO(synk): dropout is identity at inference; training-mode dropout
    # (pltpu.prng_* + mask) is intentionally not applied here.
    # (tm, tk) @ (tk, d_model): contiguous wo tile, native (K,N) orientation.
    return jnp.dot(h.astype(wo_ref.dtype), wo_ref[...],
                   preferred_element_type=jnp.float32)


def _expert_kernel_single_k(x_ref, wi_ref, wo_ref, o_ref):
    # k_tiles == 1: no accumulator needed at all.
    o_ref[...] = _ffn_tile(x_ref, wi_ref, wo_ref).astype(o_ref.dtype)


def _expert_kernel_acc_out(x_ref, wi_ref, wo_ref, o_ref):
    # k_tiles > 1 and f32 output: accumulate directly into the resident output
    # block (saves the VMEM scratch and the final full-tile copy).
    k = pl.program_id(2)

    @pl.when(k == 0)
    def _():
        o_ref[...] = jnp.zeros_like(o_ref)

    o_ref[...] += _ffn_tile(x_ref, wi_ref, wo_ref)


def _expert_kernel_acc_scratch(x_ref, wi_ref, wo_ref, o_ref, acc_ref):
    # k_tiles > 1 and non-f32 output: f32 scratch accumulator, cast at the end.
    k = pl.program_id(2)

    @pl.when(k == 0)
    def _():
        acc_ref[...] = jnp.zeros_like(acc_ref)

    acc_ref[...] += _ffn_tile(x_ref, wi_ref, wo_ref)

    @pl.when(k == pl.num_programs(2) - 1)
    def _():
        o_ref[...] = acc_ref[...].astype(o_ref.dtype)


# --------------------------------------------------------------------------- #
# Weight preparation (one-time, at model load)
# --------------------------------------------------------------------------- #
def prepare_switch_expert_weights(wi_stack, wo_stack, *, compute_dtype=None):
    """One-time transform of nn.Linear-layout expert weight stacks.

      wi_stack: (E, d_ff, d_model)  ->  wi_t: (E, d_model, d_ff)   ((K,N) for x @ wi)
      wo_stack: (E, d_model, d_ff)  ->  wo_t: (E, d_ff,  d_model)  ((K,N) for h @ wo,
                                                                    contiguous HBM tiles)
    Optionally cast the static weights to a narrower compute dtype (e.g. bf16)
    to halve weight HBM traffic and use the fast MXU path.
    """
    wi_t = jnp.transpose(wi_stack, (0, 2, 1))
    wo_t = jnp.transpose(wo_stack, (0, 2, 1))
    if compute_dtype is not None:
        wi_t = wi_t.astype(compute_dtype)
        wo_t = wo_t.astype(compute_dtype)
    return wi_t, wo_t


def _weight_spec(block_shape, index_map, buffers):
    """BlockSpec for a weight stream; optional deeper pipelining."""
    if buffers > 2 and hasattr(pl, "Buffered"):
        try:
            return pl.BlockSpec(block_shape, index_map,
                                pipeline_mode=pl.Buffered(buffers))
        except TypeError:
            pass  # pipeline_mode not supported in this jax version -> default.
    return pl.BlockSpec(block_shape, index_map)


# --------------------------------------------------------------------------- #
# Wrapper
# --------------------------------------------------------------------------- #
def fused_switch_expert(dispatched_states, wi_t, wo_t, capacity,
                        *, tm=None, tk=None, weight_buffers=2):
    """dispatched_states: (num_experts*capacity, d_model)
       wi_t: (num_experts, d_model, d_ff)   -- from prepare_switch_expert_weights
       wo_t: (num_experts, d_ff,  d_model)  -- from prepare_switch_expert_weights
       weight_buffers: pipelining depth for the weight streams (sweep 2 vs 3
       per generation; 3 only pays when the weight DMA is marginally exposed
       and VMEM permits).
    """
    num_experts, d_model, d_ff = wi_t.shape
    T, dm = dispatched_states.shape
    assert dm == d_model
    assert T == num_experts * capacity
    assert wo_t.shape == (num_experts, d_ff, d_model)

    out_dtype = dispatched_states.dtype
    act_isz = jnp.dtype(dispatched_states.dtype).itemsize
    w_isz = jnp.dtype(wi_t.dtype).itemsize
    out_isz = jnp.dtype(out_dtype).itemsize
    out_is_f32 = jnp.dtype(out_dtype) == jnp.dtype(jnp.float32)

    # ---- Generation-aware VMEM budget (v5e/v6e: 128 MiB, v7x: 64 MiB) ------ #
    try:
        vmem_cap = int(pltpu.get_tpu_info().vmem_capacity_bytes)
    except Exception:  # pragma: no cover - conservative fallback
        vmem_cap = 64 << 20
    if vmem_cap >= (96 << 20):          # 128 MiB parts: use most of it
        budget = 100 << 20
    else:                               # 64 MiB parts: leave pipeline headroom
        budget = min(52 << 20, int(0.8 * vmem_cap))

    def _est(tm_, tk_, wbuf):
        k_tiles_ = d_ff // tk_
        scratch = tm_ * d_model * 4 if (k_tiles_ > 1 and not out_is_f32) else 0
        return (2 * tm_ * d_model * act_isz          # x tile, double-buffered
                + wbuf * 2 * d_model * tk_ * w_isz   # wi + wo tiles, `wbuf` deep
                + 2 * tm_ * d_model * out_isz        # out tile, double-buffered
                + tm_ * tk_ * 4                      # f32 h temp
                + scratch)                           # f32 accumulator (if any)

    # ---- Tile selection: prefer m_tiles == 1 (no weight re-streaming) ----- #
    if tm is None:
        tm = capacity
    if tk is None:
        tk = min(d_ff, 512)
    while _est(tm, tk, max(2, weight_buffers)) > budget:
        # Shrink tk first (total weight HBM traffic is independent of tk),
        # then tm; keep (8,128)-friendly multiples.
        if tk > 128 and d_ff % (tk // 2) == 0:
            tk //= 2
        elif tm > 8 and capacity % (tm // 2) == 0 and (tm // 2) % 8 == 0:
            tm //= 2
        else:
            break

    assert capacity % tm == 0, "capacity must be divisible by the token tile"
    assert d_ff % tk == 0, "d_ff must be divisible by the reduction tile"
    assert tm % 8 == 0, "token tile must be a multiple of 8 (sublane)"
    assert tk % 128 == 0 or tk == d_ff, "d_ff tile must be a multiple of 128"

    m_tiles = capacity // tm
    k_tiles = d_ff // tk

    # Deeper weight pipelining only if it still fits the budget.
    if weight_buffers > 2 and _est(tm, tk, weight_buffers) > budget:
        weight_buffers = 2

    # ---- Block specs ------------------------------------------------------- #
    x_spec = pl.BlockSpec((tm, d_model), lambda e, m, k: (e * m_tiles + m, 0))
    wi_spec = _weight_spec((None, d_model, tk), lambda e, m, k: (e, 0, k),
                           weight_buffers)
    wo_spec = _weight_spec((None, tk, d_model), lambda e, m, k: (e, k, 0),
                           weight_buffers)
    # Output block index independent of k -> resident accumulator across the
    # reduction axis; lane-dense (full d_model) stores.
    out_spec = pl.BlockSpec((tm, d_model), lambda e, m, k: (e * m_tiles + m, 0))

    if k_tiles == 1:
        kernel = _expert_kernel_single_k
        scratch_shapes = []
    elif out_is_f32:
        kernel = _expert_kernel_acc_out
        scratch_shapes = []
    else:
        kernel = _expert_kernel_acc_scratch
        scratch_shapes = [pltpu.VMEM((tm, d_model), jnp.float32)]

    grid_spec = pltpu.PrefetchScalarGridSpec(
        num_scalar_prefetch=0,
        grid=(num_experts, m_tiles, k_tiles),
        in_specs=[x_spec, wi_spec, wo_spec],
        out_specs=out_spec,
        scratch_shapes=scratch_shapes,
    )

    # ---- Cost estimate (advisory): weights are re-read once per m tile ---- #
    flops = 4 * T * d_model * d_ff  # two matmuls, 2 flops per MAC
    w_bytes = wi_t.size * w_isz + wo_t.size * jnp.dtype(wo_t.dtype).itemsize
    act_bytes = T * d_model * (act_isz + out_isz)
    cost = pl.CostEstimate(flops=flops, transcendentals=0,
                           bytes_accessed=m_tiles * w_bytes + act_bytes)

    # ---- VMEM limit: needed + headroom, clamped per generation ------------ #
    vmem_needed = _est(tm, tk, weight_buffers)
    gen_cap = (100 << 20) if vmem_cap >= (96 << 20) else (56 << 20)
    vmem_limit = int(min(gen_cap, max(32 << 20, vmem_needed + (8 << 20))))
    vmem_limit = max(vmem_limit, vmem_needed)

    return pl.pallas_call(
        kernel,
        out_shape=jax.ShapeDtypeStruct((T, d_model), out_dtype),
        grid_spec=grid_spec,
        compiler_params=pltpu.CompilerParams(
            dimension_semantics=("parallel", "parallel", "arbitrary"),
            vmem_limit_bytes=vmem_limit),
        cost_estimate=cost,
    )(dispatched_states, wi_t, wo_t)


# --------------------------------------------------------------------------- #
# Pure-JAX reference (takes nn.Linear-layout weights, HIGHEST precision)
# --------------------------------------------------------------------------- #
def reference(dispatched_states, wi_stack, wo_stack, capacity):
    num_experts = wi_stack.shape[0]
    outs = []
    for e in range(num_experts):
        x_e = dispatched_states[e * capacity:(e + 1) * capacity]
        h = jnp.maximum(
            jnp.einsum("td,fd->tf", x_e, wi_stack[e],
                       precision=lax.Precision.HIGHEST), 0.0)
        outs.append(jnp.einsum("tf,df->td", h, wo_stack[e],
                               precision=lax.Precision.HIGHEST))
    return jnp.concatenate(outs, axis=0)


# --------------------------------------------------------------------------- #
# Self-test
# --------------------------------------------------------------------------- #
if __name__ == "__main__":
    def run_case(num_experts, capacity, d_model, d_ff, key):
        T = num_experts * capacity
        kx, kwi, kwo = jax.random.split(key, 3)
        x = jax.random.normal(kx, (T, d_model), dtype=jnp.float32)
        # Expert weights in nn.Linear layout: (out_features, in_features)
        wi = 0.1 * jax.random.normal(kwi, (num_experts, d_ff, d_model), jnp.float32)
        wo = 0.1 * jax.random.normal(kwo, (num_experts, d_model, d_ff), jnp.float32)
        # One-time model-load transform (no per-call HBM transpose).
        wi_t, wo_t = prepare_switch_expert_weights(wi, wo)

        out = fused_switch_expert(x, wi_t, wo_t, capacity)
        out = jax.block_until_ready(out)

        ref = reference(x, wi, wo, capacity)
        assert out.shape == (T, d_model)
        max_err = float(jnp.max(jnp.abs(out - ref)))
        assert jnp.allclose(out, ref, atol=2e-3, rtol=2e-3), (
            f"mismatch vs reference: max abs err = {max_err}")

    key = jax.random.PRNGKey(0)
    k1, k2 = jax.random.split(key)

    # Case 1: k_tiles == 1 path (no accumulator, direct write).
    run_case(num_experts=4, capacity=16, d_model=128, d_ff=512, key=k1)

    # Case 2: multi-step reduction path (tm = capacity, k_tiles = 4,
    # f32 accumulate directly into the resident output block).
    run_case(num_experts=4, capacity=32, d_model=128, d_ff=2048, key=k2)

    print("KERNEL_OK")
</pallas_src>

<mosaic_0001>
module attributes {stable_mosaic.version = 11 : i64} {
  func.func @_expert_kernel_single_k(%arg0: i32, %arg1: i32, %arg2: i32, %arg3: memref<16x128xf32, #tpu.memory_space<vmem>>, %arg4: memref<1x128x512xf32, #tpu.memory_space<vmem>>, %arg5: memref<1x512x128xf32, #tpu.memory_space<vmem>>, %arg6: memref<16x128xf32, #tpu.memory_space<vmem>>) attributes {dimension_semantics = [#tpu.dimension_semantics<parallel>, #tpu.dimension_semantics<parallel>, #tpu.dimension_semantics<arbitrary>], iteration_bounds = array<i64: 4, 1, 1>, scalar_prefetch = 0 : i64, scratch_operands = 0 : i64, tpu.core_type = #tpu.core_type<tc>, window_params = [{transform_indices = @transform_0, window_bounds = array<i64: 16, 128>}, {transform_indices = @transform_1, window_bounds = array<i64: 1, 128, 512>}, {transform_indices = @transform_2, window_bounds = array<i64: 1, 512, 128>}, {transform_indices = @transform_3, window_bounds = array<i64: 16, 128>}]} {
    %c0 = arith.constant 0 : index
    %c0_0 = arith.constant 0 : index
    %0 = vector.load %arg3[%c0, %c0_0] : memref<16x128xf32, #tpu.memory_space<vmem>>, vector<16x128xf32>
    %c0_1 = arith.constant 0 : index
    %c0_2 = arith.constant 0 : index
    %c0_3 = arith.constant 0 : index
    %1 = vector.load %arg4[%c0_1, %c0_2, %c0_3] : memref<1x128x512xf32, #tpu.memory_space<vmem>>, vector<1x128x512xf32>
    %2 = vector.shape_cast %1 : vector<1x128x512xf32> to vector<128x512xf32>
    %cst = arith.constant dense<0.000000e+00> : vector<16x512xf32>
    %3 = tpu.matmul %0, %2, %cst {dimension_numbers = #tpu.dot_dimension_numbers<[1], [0], [0], [1], [0, 0, 1, 1], [], []>} : vector<16x128xf32>, vector<128x512xf32>, vector<16x512xf32> -> vector<16x512xf32>
    %cst_4 = arith.constant 0.000000e+00 : f32
    %4 = vector.broadcast %cst_4 : f32 to vector<16x512xf32>
    %5 = arith.maximumf %3, %4 : vector<16x512xf32>
    %c0_5 = arith.constant 0 : index
    %c0_6 = arith.constant 0 : index
    %c0_7 = arith.constant 0 : index
    %6 = vector.load %arg5[%c0_5, %c0_6, %c0_7] : memref<1x512x128xf32, #tpu.memory_space<vmem>>, vector<1x512x128xf32>
    %7 = vector.shape_cast %6 : vector<1x512x128xf32> to vector<512x128xf32>
    %cst_8 = arith.constant dense<0.000000e+00> : vector<16x128xf32>
    %8 = tpu.matmul %5, %7, %cst_8 {dimension_numbers = #tpu.dot_dimension_numbers<[1], [0], [0], [1], [0, 0, 1, 1], [], []>} : vector<16x512xf32>, vector<512x128xf32>, vector<16x128xf32> -> vector<16x128xf32>
    %c0_9 = arith.constant 0 : index
    %c0_10 = arith.constant 0 : index
    %9 = vector.load %arg6[%c0_9, %c0_10] : memref<16x128xf32, #tpu.memory_space<vmem>>, vector<16x128xf32>
    tpu.vector_store %arg6[%c0_9, %c0_10], %8 {strides = array<i32>} : memref<16x128xf32, #tpu.memory_space<vmem>>, vector<16x128xf32>,
    return
  }
  func.func @transform_0(%arg0: i32, %arg1: i32, %arg2: i32) -> (i32, i32) {
    %c1_i32 = arith.constant 1 : i32
    %0 = arith.muli %arg0, %c1_i32 : i32
    %1 = arith.addi %0, %arg1 : i32
    %c0_i32 = arith.constant 0 : i32
    %c0_i32_0 = arith.constant 0 : i32
    return %1, %c0_i32 : i32, i32
  }
  func.func @transform_1(%arg0: i32, %arg1: i32, %arg2: i32) -> (i32, i32, i32) {
    %c0_i32 = arith.constant 0 : i32
    %c0_i32_0 = arith.constant 0 : i32
    return %arg0, %c0_i32, %arg2 : i32, i32, i32
  }
  func.func @transform_2(%arg0: i32, %arg1: i32, %arg2: i32) -> (i32, i32, i32) {
    %c0_i32 = arith.constant 0 : i32
    %c0_i32_0 = arith.constant 0 : i32
    return %arg0, %arg2, %c0_i32 : i32, i32, i32
  }
  func.func @transform_3(%arg0: i32, %arg1: i32, %arg2: i32) -> (i32, i32) {
    %c1_i32 = arith.constant 1 : i32
    %0 = arith.muli %arg0, %c1_i32 : i32
    %1 = arith.addi %0, %arg1 : i32
    %c0_i32 = arith.constant 0 : i32
    %c0_i32_0 = arith.constant 0 : i32
    return %1, %c0_i32 : i32, i32
  }
}

</mosaic_0001>

<bundles_post_ra>
// kernel: tpu_custom_call.1
= control target key start
LH: loop header
LB: loop body
LE: loop exit
PB: predicated region body
PF: predicated region fallthrough
CT: control target
= control target key end

     0   :  { %s1831_s0 = inlined_call_operand.hbm [shape: f32[64,128], index: 0, kind: input, shape index: {}]   ;;  %s1832_s1 = inlined_call_operand.hbm [shape: f32[4,128,512], index: 1, kind: input, shape index: {}]   ;;  %s1833_s2 = inlined_call_operand.hbm [shape: f32[4,512,128], index: 2, kind: input, shape index: {}]   ;;  %s1834_s3 = inlined_call_operand.hbm [shape: f32[64,128], index: 3, kind: output, shape index: {}]  }
   0x1   :  { %1839 = sst [smem:[#allocation14_spill]] %s1832_s1 }
   0x2   :  { %8 = vsyncpa [#allocation3], 0 }
   0x3   :  { %10 = vsyncpa [#allocation3 + $0x1], 0 }
   0x4   :  { %11 = vsyncpa [#allocation6], 0 }
   0x5   :  { %13 = vsyncpa [#allocation6 + $0x1], 0 }
   0x6   :  { %14 = vsyncpa [#allocation4], 0 }
   0x7   :  { %16 = vsyncpa [#allocation4 + $0x1], 0  ;;  %s1414_s12 = smov 0   ;;  %s1416_s13 = smov 0  }
   0x8   :  { %s1418_s14 = smov 0   ;;  %s1420_s15 = smov 0  }
   0x9   :  { %s1422_s16 = smov 0   ;;  %s1424_s17 = smov 0  }
   0xa LB: > { %1840 = sst [smem:[#allocation12_spill]] %s1377_s16  ;;  %s1445_s18 = sadd.s32 4294967295, %s1381_s17   ;;  %s1381_s17 = sphi %s1424_s17, %s22_s17   ;;  %s1377_s16 = sphi %s1422_s16, %s1855_s16   ;;  %s1373_s15 = sphi %s1420_s15, %s1854_s15   ;;  %s1369_s14 = sphi %s1418_s14, %s1858_s14   ;;  %s1365_s13 = sphi %s1416_s13, %s1857_s13   ;;  %s1361_s12 = sphi %s1414_s12, %s1856_s12  }
   0xb   : > { %s896_s19 = sadd.s32 4294967294, %s1381_s17   ;;  %s41_s20 = sadd.s32 1, %s1377_s16 }
   0xc   : > { %s50_s21 = sadd.s32 1, %s1369_s14  ;;  %p43_p0 = scmp.ge.s32.totalorder %s41_s20, 4 }
   0xd   : > { %p57_p1 = scmp.ne.s32.totalorder %s1369_s14, %s1365_s13  ;;  %p58_p2 = scmp.eq.s32.totalorder %s1381_s17, 0 }
   0xe   : > { %p63_p3 = scmp.ne.s32.totalorder %s1365_s13, %s1361_s12  ;;  %s1860_s20 = smov (%p43_p0, %s41_s20), 0 }
   0xf   : > { %1841 = sst [smem:[#allocation13_spill]] %s1860_s20  ;;  %p1457_p4 = por %p58_p2, %p57_p1 }
  0x10   : > { %p64_p5 = scmp.eq.s32.totalorder %s1445_s18, 0  ;;  %s47_s23 = ssub.s32 %s1377_s16, %s1860_s20 }
  0x11   : > { %p145_p6 = scmp.eq.s32.totalorder %s1445_s18, 3  ;;  %p48_p7 = scmp.eq.s32.totalorder %s47_s23, 0 }
  0x12   : > { %p1465_p8 = por %p64_p5, %p63_p3  ;;  %p151_p10 = scmp.eq.s32.totalorder %s896_s19, 3 }
  0x13   : > { %p1469_p9 = por %p145_p6, %p57_p1  ;;  %p1148_p12 = scmp.lt.s32.totalorder %s1381_s17, 4 }
  0x14   : > { %s1843_s24 = scalar_select %p1465_p8, 1, 0 }
  0x15   : > { %s1844_s25 = scalar_select %p1469_p9, 1, 0 }
  0x16   : > { %s1474_s26 = scalar_select %p48_p7, %s1369_s14, %s50_s21  }
  0x17   : > { %p1476_p11 = por %p151_p10, %p63_p3  ;;  %s1482_s28 = sand.u32 1, %s1369_s14  }
  0x18   : > { %s193_s29 = sand.u32 1, %s1381_s17   ;;  %s902_s30 = sshll.u32 %s1482_s28, 9 }
  0x19   : > { %s1845_s27 = scalar_select %p1476_p11, 1, 0 }
  0x1a   : > { %p1488_p13 = pnand %p1148_p12, %p1457_p4  ;;  %s919_s5 = sshll.u32 %s1377_s16, 13 }
  0x1b   : > { %s1847_s1 = sld [smem:[#allocation14_spill]]  ;;  %s197_s9 = scalar_lea.vmem [#allocation5], %s902_s30 }
  0x1c   : > { %s206_s10 = sshll.u32 %s197_s9, 4  ;;  %s1504_s11 = scalar_lea.sflag [#allocation6], %s193_s29  ;;  %s1502_s10 = int_to_ptr.vmem [resolvable:$true] %s206_s10 }
  0x1d   : > { %p1510_p1 = pneg %p1488_p13 }
  0x21   : > { %s1498_s8 = scalar_lea.hbm %s1847_s1, %s919_s5  ;;  %s1210_s6 = scalar_lea.hbm %s1847_s1, 32768 }
  0x22   : > { %s1205_s19 = scalar_lea.hbm %s1498_s8, 8192  ;;  %p1211_p4 = scmp.lt.u32.totalorder %s1498_s8, %s1847_s1 }
  0x23   : > { %p1206_p0 = scmp.ne.s32.totalorder %s1498_s8, %s1205_s19  ;;  %p1212_p5 = scmp.lt.u32.totalorder %s1210_s6, %s1205_s19 }
  0x24   : > { %p1214_p7 = scmp.lt.u32.totalorder %s1205_s19, %s1498_s8 }
  0x25   : > { %p1208_p2 = pnand %p1510_p1, %p1206_p0  ;;  %p1213_p6 = por %p1212_p5, %p1211_p4 }
  0x27   : > { %p1209_p3 = pneg %p1208_p2  ;;  %p1215_p10 = por %p1214_p7, %p1213_p6 }
  0x29   : > { %p1216_p12 = pnand %p1215_p10, %p1209_p3 }
  0x2b   : > { %1219 = shalt.err (!%p1216_p12)
}
  0x2c   : > { %s1220_s29 = scalar_lea.vmem %s1502_s10, 8192  ;;  %s1383_s22 = smov [#allocation5]  }
  0x2d   : > { %p1221_p0 = scmp.ne.s32.totalorder %s1502_s10, %s1220_s29  ;;  %s1225_s23 = sshll.u32 %s1383_s22, 4  ;;  %s1226_s23 = int_to_ptr.vmem [resolvable:$false] %s1225_s23 }
  0x2e   : > { %s1227_s7 = scalar_lea.vmem %s1226_s23, 16384  ;;  %p1228_p9 = scmp.lt.s32.totalorder %s1502_s10, %s1226_s23 }
  0x2f   : > { %p1223_p2 = pnand %p1221_p0, %p1510_p1  ;;  %p1229_p8 = scmp.lt.s32.totalorder %s1227_s7, %s1220_s29 }
  0x31   : > { %p1224_p11 = pneg %p1223_p2  ;;  %p1230_p4 = por %p1229_p8, %p1228_p9 }
  0x33   : > { %p1231_p5 = pnand %p1230_p4, %p1224_p11 }
  0x35   : > { %1234 = shalt.err (!%p1231_p5)
}
  0x36   : > { %s1384_s19 = smov 512   ;;  %s1385_s6 = smov 32  }
  0x37   : > { %1140 = dma.hbm_to_vmem [thread:$0]  (!%p1488_p13), %s1498_s8, 8192, %s1502_s10, %s1504_s11, %s1384_s19, %s1384_s19, %s1385_s6  }
  0x38   : > { %s1539_s22 = scalar_lea.hbm %s1833_s2, %s919_s5  ;;  %s220_s23 = scalar_lea.vmem [#allocation7], %s902_s30 }
  0x39   : > { %s229_s7 = sshll.u32 %s220_s23, 4  ;;  %p908_p8 = scmp.ge.s32.totalorder %s1381_s17, 1  ;;  %s1544_s7 = int_to_ptr.vmem [resolvable:$true] %s229_s7 }
  0x3a   : > { %p237_p9 = scmp.lt.s32.totalorder %s1381_s17, 5  ;;  %s899_s20 = sshll.u32 %s1482_s28, 4 }
  0x3b   : > { %s918_s8 = sshll.u32 %s1377_s16, 8  ;;  %s175_s30 = scalar_lea.vmem [#allocation2], %s899_s20 }
  0x3c   : > { %p1547_p11 = pnand %p908_p8, %p237_p9  ;;  %s1556_s6 = scalar_lea.hbm %s1831_s0, %s918_s8 }
  0x3d   : > { %s183_s5 = sshll.u32 %s175_s30, 4  ;;  %s172_s9 = scalar_lea.sflag [#allocation3], %s1482_s28  ;;  %s1558_s5 = int_to_ptr.vmem [resolvable:$true] %s183_s5 }
  0x3e   : > { %s1849_s1 = scalar_select %p1547_p11, 1, 0 }
  0x3f   : > { %s1235_s29 = scalar_lea.hbm %s1556_s6, 256  ;;  %s1240_s10 = scalar_lea.hbm %s1831_s0, 1024 }
  0x40   : > { %p1236_p3 = scmp.ne.s32.totalorder %s1556_s6, %s1235_s29  ;;  %p1241_p10 = scmp.lt.u32.totalorder %s1556_s6, %s1831_s0 }
  0x41   : > { %p1242_p12 = scmp.lt.u32.totalorder %s1240_s10, %s1235_s29  ;;  %p1244_p2 = scmp.lt.u32.totalorder %s1235_s29, %s1556_s6 }
  0x42   : > { %p1238_p6 = pnand %p1236_p3, %p1510_p1 }
  0x43   : > { %p1243_p0 = por %p1242_p12, %p1241_p10 }
  0x44   : > { %p1239_p7 = pneg %p1238_p6 }
  0x45   : > { %p1245_p4 = por %p1244_p2, %p1243_p0 }
  0x47   : > { %p1246_p5 = pnand %p1245_p4, %p1239_p7 }
  0x49   : > { %1249 = shalt.err (!%p1246_p5)
}
  0x4a   : > { %s1250_s20 = scalar_lea.vmem %s1558_s5, 256  ;;  %s1386_s16 = smov [#allocation2]  }
  0x4b   : > { %p1251_p8 = scmp.ne.s32.totalorder %s1558_s5, %s1250_s20  ;;  %s1255_s30 = sshll.u32 %s1386_s16, 4  ;;  %s1256_s30 = int_to_ptr.vmem [resolvable:$false] %s1255_s30 }
  0x4c   : > { %s1257_s23 = scalar_lea.vmem %s1256_s30, 512  ;;  %p1258_p6 = scmp.lt.s32.totalorder %s1558_s5, %s1256_s30 }
  0x4d   : > { %p1253_p9 = pnand %p1251_p8, %p1510_p1  ;;  %p1259_p11 = scmp.lt.s32.totalorder %s1257_s23, %s1250_s20 }
  0x4f   : > { %p1254_p3 = pneg %p1253_p9  ;;  %p1260_p10 = por %p1259_p11, %p1258_p6 }
  0x51   : > { %p1261_p12 = pnand %p1260_p10, %p1254_p3 }
  0x53   : > { %1264 = shalt.err (!%p1261_p12)
}
  0x54   : > { %s1387_s29 = smov 128   ;;  %s1388_s10 = smov 8  }
  0x55   : > { %1137 = dma.hbm_to_vmem [thread:$0]  (!%p1488_p13), %s1556_s6, 256, %s1558_s5, %s172_s9, %s1387_s29, %s1387_s29, %s1388_s10  }
  0x56   : > { %s1265_s8 = scalar_lea.hbm %s1539_s22, 8192  ;;  %s1270_s16 = scalar_lea.hbm %s1833_s2, 32768 }
  0x57   : > { %p1266_p11 = scmp.ne.s32.totalorder %s1539_s22, %s1265_s8  ;;  %p1271_p2 = scmp.lt.u32.totalorder %s1539_s22, %s1833_s2 }
  0x58   : > { %p1272_p4 = scmp.lt.u32.totalorder %s1270_s16, %s1265_s8  ;;  %p1274_p8 = scmp.lt.u32.totalorder %s1265_s8, %s1539_s22 }
  0x59   : > { %p1268_p7 = pnand %p1266_p11, %p1510_p1 }
  0x5a   : > { %p1273_p5 = por %p1272_p4, %p1271_p2 }
  0x5b   : > { %p1269_p0 = pneg %p1268_p7 }
  0x5c   : > { %p1275_p9 = por %p1274_p8, %p1273_p5 }
  0x5e   : > { %p1276_p3 = pnand %p1275_p9, %p1269_p0 }
  0x60   : > { %1279 = shalt.err (!%p1276_p3)
}
  0x61   : > { %s1280_s28 = scalar_lea.vmem %s1544_s7, 8192  ;;  %s1389_s6 = smov [#allocation7]  }
  0x62   : > { %p1281_p6 = scmp.ne.s32.totalorder %s1544_s7, %s1280_s28  ;;  %s1285_s5 = sshll.u32 %s1389_s6, 4  ;;  %s1286_s5 = int_to_ptr.vmem [resolvable:$false] %s1285_s5 }
  0x63   : > { %s1287_s9 = scalar_lea.vmem %s1286_s5, 16384  ;;  %p1288_p11 = scmp.lt.s32.totalorder %s1544_s7, %s1286_s5 }
  0x64   : > { %p1283_p10 = pnand %p1281_p6, %p1510_p1  ;;  %p1289_p7 = scmp.lt.s32.totalorder %s1287_s9, %s1280_s28 }
  0x66   : > { %p1284_p12 = pneg %p1283_p10  ;;  %p1290_p2 = por %p1289_p7, %p1288_p11 }
  0x68   : > { %p1291_p4 = pnand %p1290_p2, %p1284_p12 }
  0x6a   : > { %1294 = shalt.err (!%p1291_p4)
}
  0x6b   : > { %1143 = dma.hbm_to_vmem [thread:$0]  (!%p1488_p13), %s1539_s22, 8192, %s1544_s7, %s1504_s11, %s1387_s29, %s1387_s29, %s1388_s10  }
  0x6c   : > { %p1850_p1 = scmp.ne.s32.totalorder %s1849_s1, 0 }
  0x6d   : > { %s1615_s21 = sand.u32 (!%p1850_p1), 1, %s1365_s13   ;;  %p1851_p0 = scmp.ne.s32.totalorder (!%p1850_p1), %s1843_s24, 0 }
  0x6e   : > { %241 = sbr.rel (%p1850_p1) target bundleno = 610 (0x262), region = 32  ;;  %s909_s8 = sshll.u32 (!%p1850_p1), %s1615_s21, 4 }
  0x6f   : > { %s244_s19 = scalar_lea.sflag (!%p1850_p1), [#allocation3], %s1615_s21  ;;  %s1621_s4 = scalar_lea.vmem (!%p1850_p1), [#allocation2], %s909_s8 }
  0x75   : > { %1348 = dma.done.wait (%p1851_p0), %s244_s19, 256  }
  0x76   : > { %1350 = vsyncadd (%p1851_p0), %s244_s19, 4294967040  ;;  %s252_s1 = sand.u32 1, %s1445_s18   ;;  %s910_s11 = sshll.u32 %s1615_s21, 9 }
  0x77   : > { %s253_s22 = scalar_lea.sflag [#allocation6], %s252_s1  ;;  %s1631_s7 = scalar_lea.vmem [#allocation5], %s910_s11 }
  0x78   : > { %1352 = dma.done.wait (%p1851_p0), %s253_s22, 16384  }
  0x79   : > { %1354 = vsyncadd (%p1851_p0), %s253_s22, 4294950912  ;;  %v1390_v0 = vmov 0.0   ;;  %v307_v1 = vld [vmem:[%s1631_s7 + $0x8] sm:$0xff]  ;;  %v309_v3 = vld [vmem:[%s1631_s7 + $0x18] sm:$0xff]  ;;  %s1705_s18 = scalar_lea.vmem [#allocation7], %s910_s11  ;;  %s297_s24 = scalar_lea.vmem [#allocation8], %s909_s8 }
  0x7a   : > { %434 = vmatprep.mubr.f32.mxu0 %v1390_v0  ;;  %511 = vmatprep.mubr.f32.mxu1 %v1390_v0  ;;  %v311_v2 = vld [vmem:[%s1631_s7 + $0x28] sm:$0xff]  ;;  %v313_v5 = vld [vmem:[%s1631_s7 + $0x38] sm:$0xff]  ;;  %v306_v6 = vld [vmem:[%s1631_s7] sm:$0xff]  ;;  %s763_s29 = sshll.u32 %s297_s24, 4  ;;  %s921_s10 = sshll.u32 %s1373_s15, 8  ;;  %s1778_s29 = int_to_ptr.vmem [resolvable:$true] %s763_s29 }
  0x7b   : > { %v998_v4 = vpack.c.bf16 %v311_v2, %v307_v1  ;;  %v310_v7 = vld [vmem:[%s1631_s7 + $0x20] sm:$0xff]  ;;  %v1030_v8 = vpack.c.bf16 %v313_v5, %v309_v3  ;;  %v308_v10 = vld [vmem:[%s1631_s7 + $0x10] sm:$0xff]  ;;  %v315_v12 = vld [vmem:[%s1631_s7 + $0x48] sm:$0xff]  ;;  %s1783_s30 = scalar_lea.hbm %s1834_s3, %s921_s10  ;;  %s749_s23 = scalar_lea.sflag [#allocation4], %s1615_s21 }
  0x7c   : > { %v1000_v9 = vpack.c.bf16 %v310_v7, %v306_v6  ;;  %v312_v11 = vld [vmem:[%s1631_s7 + $0x30] sm:$0xff]  ;;  %v319_v14 = vld [vmem:[%s1631_s7 + $0x68] sm:$0xff]  ;;  %v317_v15 = vld [vmem:[%s1631_s7 + $0x58] sm:$0xff]  ;;  %s1295_s28 = scalar_lea.vmem %s1778_s29, 256  ;;  %p1852_p5 = scmp.ne.s32.totalorder %s1844_s25, 0 }
  0x7d   : > { %999 = vmatprep.subr.bf16.mxu0 %v998_v4  ;;  %v1032_v13 = vpack.c.bf16 %v312_v11, %v308_v10  ;;  %v321_v16 = vld [vmem:[%s1631_s7 + $0x78] sm:$0xff]  ;;  %1031 = vmatprep.subr.bf16.mxu1 %v1030_v8  ;;  %v1002_v17 = vpack.c.bf16 %v319_v14, %v315_v12  ;;  %v314_v19 = vld [vmem:[%s1631_s7 + $0x40] sm:$0xff]  ;;  %v316_v21 = vld [vmem:[%s1631_s7 + $0x50] sm:$0xff]  ;;  %p1296_p13 = scmp.ne.s32.totalorder %s1778_s29, %s1295_s28  ;;  %s1391_s15 = smov [#allocation8]  }
  0x7e   : > { %1001 = vmatpush1.bf16.msra.mxu0 %v1000_v9  ;;  %v1034_v18 = vpack.c.bf16 %v321_v16, %v317_v15  ;;  %v318_v20 = vld [vmem:[%s1631_s7 + $0x60] sm:$0xff]  ;;  %v320_v23 = vld [vmem:[%s1631_s7 + $0x70] sm:$0xff]  ;;  %v323_v24 = vld [vmem:[%s1631_s7 + $0x88] sm:$0xff]  ;;  %s1299_s6 = sshll.u32 %s1391_s15, 4  ;;  %s1300_s6 = int_to_ptr.vmem [resolvable:$false] %s1299_s6 }
  0x7f   : > { %1033 = vmatpush1.bf16.msra.mxu1 %v1032_v13  ;;  %v1004_v22 = vpack.c.bf16 %v318_v20, %v314_v19  ;;  %v327_v25 = vld [vmem:[%s1631_s7 + $0xa8] sm:$0xff]  ;;  %1003 = vmatprep.subr.bf16.mxu0 %v1002_v17  ;;  %v1036_v26 = vpack.c.bf16 %v320_v23, %v316_v21  ;;  %v325_v28 = vld [vmem:[%s1631_s7 + $0x98] sm:$0xff]  ;;  %v322_v30 = vld [vmem:[%s1631_s7 + $0x80] sm:$0xff]  ;;  %p1297_p8 = pnand %p1296_p13, %p1852_p5  ;;  %s1301_s5 = scalar_lea.vmem %s1300_s6, 512 }
  0x80   : > { %1035 = vmatprep.subr.bf16.mxu1 %v1034_v18  ;;  %v1006_v27 = vpack.c.bf16 %v327_v25, %v323_v24  ;;  %v329_v29 = vld [vmem:[%s1631_s7 + $0xb8] sm:$0xff]  ;;  %v326_v32 = vld [vmem:[%s1631_s7 + $0xa0] sm:$0xff]  ;;  %v324_v33 = vld [vmem:[%s1631_s7 + $0x90] sm:$0xff]  ;;  %p1302_p3 = scmp.lt.s32.totalorder %s1778_s29, %s1300_s6  ;;  %p1303_p6 = scmp.lt.s32.totalorder %s1301_s5, %s1295_s28 }
  0x81   : > { %v1038_v31 = vpack.c.bf16 %v329_v29, %v325_v28  ;;  %v328_v34 = vld [vmem:[%s1631_s7 + $0xb0] sm:$0xff]  ;;  %v1008_v35 = vpack.c.bf16 %v326_v32, %v322_v30  ;;  %v331_v36 = vld [vmem:[%s1631_s7 + $0xc8] sm:$0xff]  ;;  %v333_v38 = vld [vmem:[%s1631_s7 + $0xd8] sm:$0xff]  ;;  %p1298_p9 = pneg %p1297_p8 }
  0x82   : > { %1005 = vmatpush1.bf16.msra.mxu0 %v1004_v22  ;;  %v335_v37 = vld [vmem:[%s1631_s7 + $0xe8] sm:$0xff]  ;;  %v1040_v39 = vpack.c.bf16 %v328_v34, %v324_v33  ;;  %v337_v41 = vld [vmem:[%s1631_s7 + $0xf8] sm:$0xff]  ;;  %v330_v42 = vld [vmem:[%s1631_s7 + $0xc0] sm:$0xff]  ;;  %p1304_p10 = por %p1303_p6, %p1302_p3 }
  0x83   : > { %1037 = vmatpush1.bf16.msra.mxu1 %v1036_v26  ;;  %1007 = vmatprep.subr.bf16.mxu0 %v1006_v27  ;;  %v1010_v40 = vpack.c.bf16 %v335_v37, %v331_v36  ;;  %v334_v43 = vld [vmem:[%s1631_s7 + $0xe0] sm:$0xff]  ;;  %v1042_v44 = vpack.c.bf16 %v337_v41, %v333_v38  ;;  %v332_v45 = vld [vmem:[%s1631_s7 + $0xd0] sm:$0xff]  ;;  %v339_v47 = vld [vmem:[%s1631_s7 + $0x108] sm:$0xff] }
  0x84   : > { %1039 = vmatprep.subr.bf16.mxu1 %v1038_v31  ;;  %v336_v46 = vld [vmem:[%s1631_s7 + $0xf0] sm:$0xff]  ;;  %v343_v48 = vld [vmem:[%s1631_s7 + $0x128] sm:$0xff]  ;;  %v341_v49 = vld [vmem:[%s1631_s7 + $0x118] sm:$0xff]  ;;  %v1012_v51 = vpack.c.bf16 %v334_v43, %v330_v42  ;;  %p1305_p12 = pnand %p1304_p10, %p1298_p9 }
  0x85   : > { %v345_v50 = vld [vmem:[%s1631_s7 + $0x138] sm:$0xff]  ;;  %v1044_v52 = vpack.c.bf16 %v336_v46, %v332_v45  ;;  %v1014_v53 = vpack.c.bf16 %v343_v48, %v339_v47  ;;  %v338_v54 = vld [vmem:[%s1631_s7 + $0x100] sm:$0xff]  ;;  %v340_v56 = vld [vmem:[%s1631_s7 + $0x110] sm:$0xff] }
  0x86   : > { %1009 = vmatpush1.bf16.msra.mxu0 %v1008_v35  ;;  %v342_v55 = vld [vmem:[%s1631_s7 + $0x120] sm:$0xff]  ;;  %v1046_v57 = vpack.c.bf16 %v345_v50, %v341_v49  ;;  %v344_v58 = vld [vmem:[%s1631_s7 + $0x130] sm:$0xff]  ;;  %v347_v59 = vld [vmem:[%s1631_s7 + $0x148] sm:$0xff] }
  0x87   : > { %1041 = vmatpush1.bf16.msra.mxu1 %v1040_v39  ;;  %1011 = vmatprep.subr.bf16.mxu0 %v1010_v40  ;;  %v351_v60 = vld [vmem:[%s1631_s7 + $0x168] sm:$0xff]  ;;  %v349_v61 = vld [vmem:[%s1631_s7 + $0x158] sm:$0xff]  ;;  %v1016_v63 = vpack.c.bf16 %v342_v55, %v338_v54  ;;  %v1048_v1 = vpack.c.bf16 %v344_v58, %v340_v56  ;;  %v346_v3 = vld [vmem:[%s1631_s7 + $0x140] sm:$0xff] }
  0x88   : > { %1043 = vmatprep.subr.bf16.mxu1 %v1042_v44  ;;  %v353_v62 = vld [vmem:[%s1631_s7 + $0x178] sm:$0xff]  ;;  %v1018_v2 = vpack.c.bf16 %v351_v60, %v347_v59  ;;  %v350_v4 = vld [vmem:[%s1631_s7 + $0x160] sm:$0xff]  ;;  %v348_v5 = vld [vmem:[%s1631_s7 + $0x150] sm:$0xff] }
  0x89   : > { %v1050_v6 = vpack.c.bf16 %v353_v62, %v349_v61  ;;  %v352_v7 = vld [vmem:[%s1631_s7 + $0x170] sm:$0xff]  ;;  %v355_v8 = vld [vmem:[%s1631_s7 + $0x188] sm:$0xff]  ;;  %v357_v10 = vld [vmem:[%s1631_s7 + $0x198] sm:$0xff]  ;;  %v1020_v12 = vpack.c.bf16 %v350_v4, %v346_v3 }
  0x8a   : > { %1013 = vmatpush1.bf16.msra.mxu0 %v1012_v51  ;;  %v359_v9 = vld [vmem:[%s1631_s7 + $0x1a8] sm:$0xff]  ;;  %v361_v11 = vld [vmem:[%s1631_s7 + $0x1b8] sm:$0xff]  ;;  %v1052_v13 = vpack.c.bf16 %v352_v7, %v348_v5  ;;  %v354_v15 = vld [vmem:[%s1631_s7 + $0x180] sm:$0xff] }
  0x8b   : > { %1045 = vmatpush1.bf16.msra.mxu1 %v1044_v52  ;;  %1015 = vmatprep.subr.bf16.mxu0 %v1014_v53  ;;  %v1022_v14 = vpack.c.bf16 %v359_v9, %v355_v8  ;;  %v358_v16 = vld [vmem:[%s1631_s7 + $0x1a0] sm:$0xff]  ;;  %v356_v17 = vld [vmem:[%s1631_s7 + $0x190] sm:$0xff]  ;;  %v1054_v18 = vpack.c.bf16 %v361_v11, %v357_v10  ;;  %v363_v20 = vld [vmem:[%s1631_s7 + $0x1c8] sm:$0xff] }
  0x8c   : > { %1047 = vmatprep.subr.bf16.mxu1 %v1046_v57  ;;  %v360_v19 = vld [vmem:[%s1631_s7 + $0x1b0] sm:$0xff]  ;;  %v367_v21 = vld [vmem:[%s1631_s7 + $0x1e8] sm:$0xff]  ;;  %v365_v22 = vld [vmem:[%s1631_s7 + $0x1d8] sm:$0xff]  ;;  %v1024_v24 = vpack.c.bf16 %v358_v16, %v354_v15 }
  0x8d   : > { %v369_v23 = vld [vmem:[%s1631_s7 + $0x1f8] sm:$0xff]  ;;  %v1056_v25 = vpack.c.bf16 %v360_v19, %v356_v17  ;;  %v1026_v26 = vpack.c.bf16 %v367_v21, %v363_v20  ;;  %v362_v27 = vld [vmem:[%s1631_s7 + $0x1c0] sm:$0xff]  ;;  %v364_v29 = vld [vmem:[%s1631_s7 + $0x1d0] sm:$0xff] }
  0x8e   : > { %1017 = vmatpush1.bf16.msra.mxu0 %v1016_v63  ;;  %v366_v28 = vld [vmem:[%s1631_s7 + $0x1e0] sm:$0xff]  ;;  %v1058_v30 = vpack.c.bf16 %v369_v23, %v365_v22  ;;  %v368_v31 = vld [vmem:[%s1631_s7 + $0x1f0] sm:$0xff]  ;;  %v549_v33 = vld [vmem:[%s1705_s18 + $0x88] sm:$0xff] }
  0x8f   : > { %1049 = vmatpush1.bf16.msra.mxu1 %v1048_v1  ;;  %1019 = vmatprep.subr.bf16.mxu0 %v1018_v2  ;;  %v548_v32 = vld [vmem:[%s1705_s18 + $0x80] sm:$0xff]  ;;  %v581_v35 = vld [vmem:[%s1705_s18 + $0x188] sm:$0xff]  ;;  %v1028_v36 = vpack.c.bf16 %v366_v28, %v362_v27  ;;  %v1060_v37 = vpack.c.bf16 %v368_v31, %v364_v29  ;;  %v550_v44 = vld [vmem:[%s1705_s18 + $0x90] sm:$0xff] }
  0x90   : > { %1051 = vmatprep.subr.bf16.mxu1 %v1050_v6  ;;  %v580_v34 = vld [vmem:[%s1705_s18 + $0x180] sm:$0xff]  ;;  %v1062_v38 = vpack.c.bf16 %v549_v33, %v548_v32  ;;  %v533_v41 = vld [vmem:[%s1705_s18 + $0x8] sm:$0xff]  ;;  %v551_v45 = vld [vmem:[%s1705_s18 + $0x98] sm:$0xff] }
  0x91   : > { %v1094_v39 = vpack.c.bf16 %v581_v35, %v580_v34  ;;  %v532_v40 = vld [vmem:[%s1705_s18] sm:$0xff]  ;;  %v565_v43 = vld [vmem:[%s1705_s18 + $0x108] sm:$0xff]  ;;  %v582_v47 = vld [vmem:[%s1705_s18 + $0x190] sm:$0xff]  ;;  %v1066_v51 = vpack.c.bf16 %v551_v45, %v550_v44 }
  0x92   : > { %1021 = vmatpush1.bf16.msra.mxu0 %v1020_v12  ;;  %v564_v42 = vld [vmem:[%s1705_s18 + $0x100] sm:$0xff]  ;;  %v583_v48 = vld [vmem:[%s1705_s18 + $0x198] sm:$0xff]  ;;  %v1064_v49 = vpack.c.bf16 %v533_v41, %v532_v40  ;;  %v534_v52 = vld [vmem:[%s1705_s18 + $0x10] sm:$0xff] }
  0x93   : > { %1053 = vmatpush1.bf16.msra.mxu1 %v1052_v13  ;;  %1023 = vmatprep.subr.bf16.mxu0 %v1022_v14  ;;  %v304_v46 = vld [vmem:[%s1621_s4] sm:$0xff]  ;;  %v1096_v50 = vpack.c.bf16 %v565_v43, %v564_v42  ;;  %v535_v53 = vld [vmem:[%s1705_s18 + $0x18] sm:$0xff]  ;;  %v1098_v55 = vpack.c.bf16 %v583_v48, %v582_v47  ;;  %v553_v58 = vld [vmem:[%s1705_s18 + $0xa8] sm:$0xff] }
  0x94   : > { %1055 = vmatprep.subr.bf16.mxu1 %v1054_v18  ;;  %v566_v54 = vld [vmem:[%s1705_s18 + $0x110] sm:$0xff]  ;;  %v567_v56 = vld [vmem:[%s1705_s18 + $0x118] sm:$0xff]  ;;  %v552_v57 = vld [vmem:[%s1705_s18 + $0xa0] sm:$0xff]  ;;  %v1068_v62 = vpack.c.bf16 %v535_v53, %v534_v52 }
  0x95   : > { %v305_v59 = vld [vmem:[%s1621_s4 + $0x8] sm:$0xff]  ;;  %v584_v60 = vld [vmem:[%s1705_s18 + $0x1a0] sm:$0xff]  ;;  %v1100_v63 = vpack.c.bf16 %v567_v56, %v566_v54  ;;  %v1070_v1 = vpack.c.bf16 %v553_v58, %v552_v57  ;;  %v554_v7 = vld [vmem:[%s1705_s18 + $0xb0] sm:$0xff] }
  0x96   : > { %1025 = vmatpush1.bf16.msra.mxu0 %v1024_v24  ;;  %v585_v61 = vld [vmem:[%s1705_s18 + $0x1a8] sm:$0xff]  ;;  %v536_v2 = vld [vmem:[%s1705_s18 + $0x20] sm:$0xff]  ;;  %v586_v8 = vld [vmem:[%s1705_s18 + $0x1b0] sm:$0xff] }
  0x97   : > { %1057 = vmatpush1.bf16.msra.mxu1 %v1056_v25  ;;  %1027 = vmatprep.subr.bf16.mxu0 %v1026_v26  ;;  %v537_v3 = vld [vmem:[%s1705_s18 + $0x28] sm:$0xff]  ;;  %v568_v4 = vld [vmem:[%s1705_s18 + $0x120] sm:$0xff]  ;;  %v1102_v5 = vpack.c.bf16 %v585_v61, %v584_v60  ;;  %v587_v9 = vld [vmem:[%s1705_s18 + $0x1b8] sm:$0xff] }
  0x98   : > { %1059 = vmatprep.subr.bf16.mxu1 %v1058_v30  ;;  %v569_v6 = vld [vmem:[%s1705_s18 + $0x128] sm:$0xff]  ;;  %v1072_v10 = vpack.c.bf16 %v537_v3, %v536_v2  ;;  %v538_v13 = vld [vmem:[%s1705_s18 + $0x30] sm:$0xff]  ;;  %v539_v14 = vld [vmem:[%s1705_s18 + $0x38] sm:$0xff]  ;;  %v1106_v16 = vpack.c.bf16 %v587_v9, %v586_v8 }
  0x99   : > { %v1104_v11 = vpack.c.bf16 %v569_v6, %v568_v4  ;;  %v570_v15 = vld [vmem:[%s1705_s18 + $0x130] sm:$0xff]  ;;  %v571_v17 = vld [vmem:[%s1705_s18 + $0x138] sm:$0xff]  ;;  %v556_v18 = vld [vmem:[%s1705_s18 + $0xc0] sm:$0xff]  ;;  %v1076_v22 = vpack.c.bf16 %v539_v14, %v538_v13 }
  0x9a   : > { %1029 = vmatpush1.bf16.msra.mxu0 %v1028_v36  ;;  %v557_v19 = vld [vmem:[%s1705_s18 + $0xc8] sm:$0xff]  ;;  %v588_v20 = vld [vmem:[%s1705_s18 + $0x1c0] sm:$0xff]  ;;  %v1108_v23 = vpack.c.bf16 %v571_v17, %v570_v15  ;;  %v558_v30 = vld [vmem:[%s1705_s18 + $0xd0] sm:$0xff] }
  0x9b   : > { %1061 = vmatpush1.bf16.msra.mxu1 %v1060_v37  ;;  %1063 = vmatprep.subr.bf16.mxu0 %v1062_v38  ;;  %v589_v21 = vld [vmem:[%s1705_s18 + $0x1c8] sm:$0xff]  ;;  %v1078_v24 = vpack.c.bf16 %v557_v19, %v556_v18  ;;  %v540_v25 = vld [vmem:[%s1705_s18 + $0x40] sm:$0xff]  ;;  %v559_v31 = vld [vmem:[%s1705_s18 + $0xd8] sm:$0xff] }
  0x9c   : > { %1095 = vmatprep.subr.bf16.mxu1 %v1094_v39  ;;  %v541_v26 = vld [vmem:[%s1705_s18 + $0x48] sm:$0xff]  ;;  %v572_v27 = vld [vmem:[%s1705_s18 + $0x140] sm:$0xff]  ;;  %v1110_v28 = vpack.c.bf16 %v589_v21, %v588_v20  ;;  %v590_v32 = vld [vmem:[%s1705_s18 + $0x1d0] sm:$0xff]  ;;  %v1082_v36 = vpack.c.bf16 %v559_v31, %v558_v30 }
  0x9d   : > { %435 = vmatmul.mubr.f32.vlgmr.msra.gmra.mrb[0].mxu0 %v304_v46  ;;  %v573_v29 = vld [vmem:[%s1705_s18 + $0x148] sm:$0xff]  ;;  %v591_v33 = vld [vmem:[%s1705_s18 + $0x1d8] sm:$0xff]  ;;  %v1080_v34 = vpack.c.bf16 %v541_v26, %v540_v25  ;;  %v542_v37 = vld [vmem:[%s1705_s18 + $0x50] sm:$0xff] }
  0x9e   : > { %512 = vmatmul.mubr.f32.vlgmr.msra.gmra.mrb[0].mxu1 %v304_v46  ;;  %440 = vmatprep.mubr.f32.mxu0 %v1390_v0  ;;  %v1112_v35 = vpack.c.bf16 %v573_v29, %v572_v27  ;;  %v543_v38 = vld [vmem:[%s1705_s18 + $0x58] sm:$0xff]  ;;  %v574_v39 = vld [vmem:[%s1705_s18 + $0x150] sm:$0xff]  ;;  %v1114_v40 = vpack.c.bf16 %v591_v33, %v590_v32  ;;  %v560_v42 = vld [vmem:[%s1705_s18 + $0xe0] sm:$0xff] }
  0x9f   : > { %517 = vmatprep.mubr.f32.mxu1 %v1390_v0  ;;  %1065 = vmatpush3.bf16.msra.mxu0 %v1064_v49  ;;  %v555_v0 = vld [vmem:[%s1705_s18 + $0xb8] sm:$0xff]  ;;  %v561_v43 = vld [vmem:[%s1705_s18 + $0xe8] sm:$0xff]  ;;  %v592_v44 = vld [vmem:[%s1705_s18 + $0x1e0] sm:$0xff]  ;;  %v1084_v46 = vpack.c.bf16 %v543_v38, %v542_v37 }
  0xa0   : > { %1097 = vmatpush3.bf16.msra.mxu1 %v1096_v50  ;;  %1067 = vmatprep.subr.bf16.mxu0 %v1066_v51  ;;  %v1074_v12 = vpack.c.bf16 %v555_v0, %v554_v7  ;;  %v575_v41 = vld [vmem:[%s1705_s18 + $0x158] sm:$0xff]  ;;  %v593_v45 = vld [vmem:[%s1705_s18 + $0x1e8] sm:$0xff]  ;;  %v1086_v48 = vpack.c.bf16 %v561_v43, %v560_v42  ;;  %v544_v49 = vld [vmem:[%s1705_s18 + $0x60] sm:$0xff] }
  0xa1   : > { %441 = vmatmul.mubr.f32.gmra.mrb[2].mxu0 %v305_v59  ;;  %1099 = vmatprep.subr.bf16.mxu1 %v1098_v55  ;;  %v1116_v47 = vpack.c.bf16 %v575_v41, %v574_v39  ;;  %v545_v50 = vld [vmem:[%s1705_s18 + $0x68] sm:$0xff]  ;;  %v1118_v51 = vpack.c.bf16 %v593_v45, %v592_v44  ;;  %v576_v52 = vld [vmem:[%s1705_s18 + $0x160] sm:$0xff]  ;;  %v562_v56 = vld [vmem:[%s1705_s18 + $0xf0] sm:$0xff] }
  0xa2   : > { %518 = vmatmul.mubr.f32.gmra.mrb[2].mxu1 %v305_v59  ;;  %v577_v53 = vld [vmem:[%s1705_s18 + $0x168] sm:$0xff]  ;;  %v1088_v54 = vpack.c.bf16 %v545_v50, %v544_v49  ;;  %v563_v57 = vld [vmem:[%s1705_s18 + $0xf8] sm:$0xff]  ;;  %v594_v58 = vld [vmem:[%s1705_s18 + $0x1f0] sm:$0xff] }
  0xa3   : > { %1069 = vmatpush3.bf16.msra.mxu0 %v1068_v62  ;;  %v1120_v55 = vpack.c.bf16 %v577_v53, %v576_v52  ;;  %v1090_v59 = vpack.c.bf16 %v563_v57, %v562_v56  ;;  %v595_v60 = vld [vmem:[%s1705_s18 + $0x1f8] sm:$0xff]  ;;  %v546_v61 = vld [vmem:[%s1705_s18 + $0x70] sm:$0xff] }
  0xa4   : > { %1101 = vmatpush3.bf16.msra.mxu1 %v1100_v63  ;;  %1071 = vmatprep.subr.bf16.mxu0 %v1070_v1  ;;  %v547_v62 = vld [vmem:[%s1705_s18 + $0x78] sm:$0xff]  ;;  %v1122_v63 = vpack.c.bf16 %v595_v60, %v594_v58  ;;  %v578_v2 = vld [vmem:[%s1705_s18 + $0x170] sm:$0xff] }
  0xa5   : > { %1103 = vmatprep.subr.bf16.mxu1 %v1102_v5  ;;  %v1092_v1 = vpack.c.bf16 %v547_v62, %v546_v61  ;;  %v579_v3 = vld [vmem:[%s1705_s18 + $0x178] sm:$0xff] }
  0xa6   : > { %v1124_v4 = vpack.c.bf16 %v579_v3, %v578_v2 }
  0xa7   : > { %1073 = vmatpush3.bf16.msra.mxu0 %v1072_v10 }
  0xa8   : > { %1105 = vmatpush3.bf16.msra.mxu1 %v1104_v11  ;;  %1075 = vmatprep.subr.bf16.mxu0 %v1074_v12 }
  0xa9   : > { %1107 = vmatprep.subr.bf16.mxu1 %v1106_v16 }
  0xab   : > { %1077 = vmatpush3.bf16.msra.mxu0 %v1076_v22 }
  0xac   : > { %1109 = vmatpush3.bf16.msra.mxu1 %v1108_v23  ;;  %1079 = vmatprep.subr.bf16.mxu0 %v1078_v24 }
  0xad   : > { %1111 = vmatprep.subr.bf16.mxu1 %v1110_v28 }
  0xaf   : > { %1081 = vmatpush3.bf16.msra.mxu0 %v1080_v34 }
  0xb0   : > { %1113 = vmatpush3.bf16.msra.mxu1 %v1112_v35  ;;  %1083 = vmatprep.subr.bf16.mxu0 %v1082_v36 }
  0xb1   : > { %1115 = vmatprep.subr.bf16.mxu1 %v1114_v40 }
  0xb3   : > { %1085 = vmatpush3.bf16.msra.mxu0 %v1084_v46 }
  0xb4   : > { %1117 = vmatpush3.bf16.msra.mxu1 %v1116_v47  ;;  %1087 = vmatprep.subr.bf16.mxu0 %v1086_v48 }
  0xb5   : > { %1119 = vmatprep.subr.bf16.mxu1 %v1118_v51 }
  0xb7   : > { %1089 = vmatpush3.bf16.msra.mxu0 %v1088_v54 }
  0xb8   : > { %1121 = vmatpush3.bf16.msra.mxu1 %v1120_v55  ;;  %1091 = vmatprep.subr.bf16.mxu0 %v1090_v59 }
  0xb9   : > { %1123 = vmatprep.subr.bf16.mxu1 %v1122_v63 }
  0xbb   : > { %1093 = vmatpush3.bf16.msra.mxu0 %v1092_v1 }
  0xbc   : > { %1125 = vmatpush3.bf16.msra.mxu1 %v1124_v4 }
 0x170   : > { %v436_v5 = vpop.f32.mrb[0].mxu0 }
 0x171   : > { %v513_v6 = vpop.f32.mrb[0].mxu1  ;;  %v438_v7 = vpop.f32.mrb[1].mxu0  ;;  %v524_v9 = vmax.f32 %v436_v5, 0.0 }
 0x172   : > { %v525_v0 = vmax.f32 %v438_v7, 0.0  ;;  %v515_v8 = vpop.f32.mrb[1].mxu1  ;;  %v526_v11 = vmax.f32 %v513_v6, 0.0 }
 0x173   : > { %v527_v10 = vmax.f32 %v515_v8, 0.0 }
 0x174   : > { %v442_v12 = vpop.f32.mrb[2].mxu0  ;;  %660 = vmatprep.mubr.f32.mxu0 %v525_v0 }
 0x175   : > { %v519_v13 = vpop.f32.mrb[2].mxu1  ;;  %735 = vmatprep.mubr.f32.mxu1 %v527_v10  ;;  %v444_v14 = vpop.f32.mrb[3].mxu0  ;;  %661 = vmatmul.mubr.f32.vlgmr.msra.gmra.mrb[4].mxu0 %v524_v9  ;;  %v528_v17 = vmax.f32 %v442_v12, 0.0 }
 0x176   : > { %v529_v15 = vmax.f32 %v444_v14, 0.0  ;;  %v521_v16 = vpop.f32.mrb[3].mxu1  ;;  %736 = vmatmul.mubr.f32.vlgmr.msra.gmra.mrb[4].mxu1 %v526_v11  ;;  %v530_v19 = vmax.f32 %v519_v13, 0.0 }
 0x177   : > { %v531_v18 = vmax.f32 %v521_v16, 0.0 }
 0x178   : > { %665 = vmatprep.mubr.f32.mxu0 %v529_v15 }
 0x179   : > { %740 = vmatprep.mubr.f32.mxu1 %v531_v18  ;;  %666 = vmatmul.mubr.f32.gmra.mrb[6].mxu0 %v528_v17 }
 0x17a   : > { %741 = vmatmul.mubr.f32.gmra.mrb[6].mxu1 %v530_v19 }
 0x248   : > { %v954_v20 = vpop.f32.mrb[4].mxu0 }
 0x249   : > { %v992_v21 = vpop.f32.mrb[4].mxu1  ;;  %v955_v22 = vpop.f32.mrb[5].mxu0 }
 0x24a   : > { %v956_v23 = vadd.f32 %v955_v22, %v954_v20  ;;  %v993_v24 = vpop.f32.mrb[5].mxu1 }
 0x24b   : > { %v994_v25 = vadd.f32 %v993_v24, %v992_v21 }
 0x24c   : > { %v957_v26 = vpop.f32.mrb[6].mxu0 }
 0x24d   : > { %v738_v27 = vadd.f32 %v994_v25, %v956_v23  ;;  %v995_v28 = vpop.f32.mrb[6].mxu1  ;;  %v958_v29 = vpop.f32.mrb[7].mxu0 }
 0x24e   : > { %v959_v30 = vadd.f32 %v958_v29, %v957_v26  ;;  %v996_v31 = vpop.f32.mrb[7].mxu1 }
 0x24f   : > { %746 = vst [vmem:[%s297_s24] sm:$0xff] %v738_v27  ;;  %v997_v32 = vadd.f32 %v996_v31, %v995_v28 }
 0x251   : > { %v743_v33 = vadd.f32 %v997_v32, %v959_v30 }
 0x253   : > { %747 = vst [vmem:[%s297_s24 + $0x8] sm:$0xff] %v743_v33 }
 0x254   : > { %1308 = shalt.err (!%p1305_p12)
}
 0x255   : > { %s1309_s9 = scalar_lea.hbm %s1783_s30, 256  ;;  %s1313_s4 = scalar_lea.hbm %s1834_s3, 1024 }
 0x256   : > { %p1310_p11 = scmp.ne.s32.totalorder %s1783_s30, %s1309_s9  ;;  %p1314_p4 = scmp.lt.u32.totalorder %s1783_s30, %s1834_s3 }
 0x257   : > { %p1315_p1 = scmp.lt.u32.totalorder %s1313_s4, %s1309_s9  ;;  %p1317_p13 = scmp.lt.u32.totalorder %s1309_s9, %s1783_s30 }
 0x258   : > { %p1311_p7 = pnand %p1310_p11, %p1852_p5 }
 0x259   : > { %p1316_p0 = por %p1315_p1, %p1314_p4 }
 0x25a   : > { %p1312_p2 = pneg %p1311_p7 }
 0x25b   : > { %p1318_p8 = por %p1317_p13, %p1316_p0 }
 0x25d   : > { %p1319_p9 = pnand %p1318_p8, %p1312_p2 }
 0x25f   : > { %1322 = shalt.err (!%p1319_p9)
}
 0x260   : > { %s1392_s22 = smov 128   ;;  %s1393_s7 = smov 8  }
 0x261   : > { %1132 = dma.vmem_to_hbm [thread:$0]  (%p1852_p5), %s1778_s29, 256, %s1783_s30, %s749_s23, %s1392_s22, %s1392_s22, %s1393_s7  }
 0x262 PF: > { %p1149_p3 = scmp.ge.s32.totalorder %s1381_s17, 2  ;;  %s778_s18 = sand.u32 1, %s1361_s12  }
 0x263   : > { %p1853_p6 = scmp.ne.s32.totalorder %s1845_s27, 0  ;;  %s779_s24 = scalar_lea.sflag [#allocation4], %s778_s18 }
 0x265   : > { %p1145_p10 = pnand %p1149_p3, %p1853_p6 }
 0x267   : > { %1356 = dma.done.wait (!%p1145_p10), %s779_s24, 256  }
 0x268   : > { %1358 = vsyncadd (!%p1145_p10), %s779_s24, 4294967040  ;;  %s22_s17 = sadd.s32 1, %s1381_s17   ;;  %s1854_s15 = sld [smem:[#allocation12_spill]] }
 0x269   : > { %p19_p12 = scmp.ge.s32.totalorder %s22_s17, 6   ;;  %s1855_s16 = sld [smem:[#allocation13_spill]] }
 0x26a   : > { %s1856_s12 = smov %s1365_s13  ;;  %s1857_s13 = smov %s1369_s14 }
 0x26b   : > { %s1858_s14 = smov %s1474_s26  ;;  %21 = sbr.rel (!%p19_p12) target bundleno = 10 (0xa), region = 101 }
 0x272   :  { %784 = vsyncpa [#allocation3], 1 }
 0x273   :  { %786 = vsyncpa [#allocation3 + $0x1], 1 }
 0x274   :  { %787 = vsyncpa [#allocation6], 1 }
 0x275   :  { %789 = vsyncpa [#allocation6 + $0x1], 1 }
 0x276   :  { %790 = vsyncpa [#allocation4], 1 }
 0x277   :  { %792 = vsyncpa [#allocation4 + $0x1], 1 }

</bundles_post_ra>
